<compile_context>
chip_gen: v5e
topology: v5e:2x2
jax: 0.10.0
libtpu: 0.0.40
codegen_flags: <defaults>
</compile_context>

<pallas_src>
import functools
import math

import jax
import jax.numpy as jnp
import numpy as np
from jax.experimental import pallas as pl
from jax.experimental.pallas import tpu as pltpu


# ----------------------------------------------------------------------------
# Pair finding (glue, plain JAX) — mirrors torch `_get_pairs`
# ----------------------------------------------------------------------------
def _from_cxcyhw_to_xyxy(boxes):
    # TODO(synk): `from_cxcyhw_to_xyxy` was not provided with the module;
    # assuming (cx, cy, h, w) -> (x1, y1, x2, y2) with x = cx -/+ w/2, y = cy -/+ h/2.
    cx, cy, h, w = boxes[..., 0], boxes[..., 1], boxes[..., 2], boxes[..., 3]
    return jnp.stack([cx - w / 2, cy - h / 2, cx + w / 2, cy + h / 2], axis=-1)


def _get_pairs(top_k_centers, epsilon=1e-6):
    B, N, _ = top_k_centers.shape
    bbox = _from_cxcyhw_to_xyxy(top_k_centers)                     # (B, N, 4)
    b1 = bbox[:, :, None, :]
    b2 = bbox[:, None, :, :]
    inter_mins = jnp.maximum(b1[..., :2], b2[..., :2])
    inter_maxs = jnp.minimum(b1[..., 2:], b2[..., 2:])
    inter_wh = inter_maxs - inter_mins                             # (no clamp — matches torch)
    inter_area = inter_wh[..., 0] * inter_wh[..., 1]               # (B, N, N)
    bbox_area = (bbox[..., 2] - bbox[..., 0]) * (bbox[..., 3] - bbox[..., 1])
    union = bbox_area[:, :, None] + bbox_area[:, None, :] - inter_area
    iou = inter_area / (union + epsilon) - jnp.eye(N, dtype=inter_area.dtype)
    pair1 = jnp.argmax(iou, axis=-1).astype(jnp.int32)             # (B, N)
    pair0 = jnp.broadcast_to(jnp.arange(N, dtype=jnp.int32)[None, :], (B, N))
    pair_idx = jnp.stack([pair0, pair1], axis=-1)                  # (B, N, 2)
    bbox_l1 = jnp.abs(bbox[..., 2] - bbox[..., 0]) + jnp.abs(bbox[..., 3] - bbox[..., 1])
    l1_pair = jnp.stack(
        [bbox_l1, jnp.take_along_axis(bbox_l1, pair1, axis=-1)], axis=-1)
    correct_order = jnp.where(
        (l1_pair[..., 0] >= l1_pair[..., 1])[..., None],
        pair_idx, pair_idx[..., ::-1])
    return correct_order                                           # (B, N, 2) int32


# ----------------------------------------------------------------------------
# Fused Pallas kernel: all (batch, head) groups of this grid step in ONE
# block-diagonal-masked matmul pair.
#   rows R = batch_per_step * H * S, each row is one (b, h, s) query
#   a2  = q @ k^T  (fused 2D contraction == lq@lk^T + rq@rk^T)   -> (R, R)
#   a2 += bias     (0 on same-(b,h) blocks, -1e30 elsewhere; pre-softmax)
#   p   = softmax(a2)          (cross-(b,h) probs are exactly 0)
#   pv  = p @ [lv|rv]                                            -> (R, 2D)
#   tail: per local batch, lane-concat the H head blocks into the torch
#   flatten order (S, H*2D), multiply by the pre-broadcast scaled keep mask,
#   and store the lane-dense slab.  The final 2-way sum is done in XLA.
# ----------------------------------------------------------------------------
def _fused_pair_attn_kernel(q_ref, k_ref, v_ref, bias_ref, mask_ref, out_ref,
                            *, heads_num, seq_len, batch_per_step):
    q = q_ref[...]                                   # (R, 2D) bf16
    k = k_ref[...]
    v = v_ref[...]

    # One fused NT contraction for every (batch, head) group in this step;
    # no explicit transpose — the MXU consumes K natively.
    a2 = jax.lax.dot_general(
        q, k, dimension_numbers=(((1,), (1,)), ((), ())),
        preferred_element_type=jnp.float32)          # (R, R) f32
    a2 = a2 + bias_ref[...]                          # kill cross-(b,h) logits pre-softmax
    a2 = a2 - jnp.max(a2, axis=-1, keepdims=True)
    e = jnp.exp(a2)
    p = e * pl.reciprocal(jnp.sum(e, axis=-1, keepdims=True), approx=True)
    pv = jnp.dot(p.astype(v.dtype), v,
                 preferred_element_type=jnp.float32)  # (R, 2D) f32

    for b in range(batch_per_step):                   # static unroll (tiny)
        base = b * heads_num * seq_len
        pieces = [pv[base + h * seq_len: base + (h + 1) * seq_len, :]
                  for h in range(heads_num)]          # H x (S, 2D)
        slab = pieces[0] if heads_num == 1 else jnp.concatenate(pieces, axis=-1)
        out_ref[b] = slab * mask_ref[b]               # (S, H*2D) lane-dense store


# ----------------------------------------------------------------------------
# Full forward (glue + kernel)
# ----------------------------------------------------------------------------
def _num_grid_steps(batch_size):
    """>=2 'parallel' grid steps only on 2-TensorCore chips (v7x); otherwise
    fold the whole batch into a single step to avoid per-step pipeline cost."""
    try:
        kind = jax.devices()[0].device_kind.lower()
    except Exception:
        kind = ""
    if ("v7" in kind or "7x" in kind) and batch_size >= 2 and batch_size % 2 == 0:
        return 2
    return 1


def pair_self_attention_forward(query, key, value, top_k_centers, heads_num):
    B, H, S, D = query.shape
    scale = 1.0 / math.sqrt(2.0 * D)

    pairs = _get_pairs(top_k_centers)                              # (B, S, 2) int32
    arange = jnp.arange(S, dtype=pairs.dtype)[None, :, None]
    keep = (pairs == arange).astype(jnp.float32) * scale           # 0 or 1/sqrt(2*d_model)
    # Pre-broadcast to the full slab width (matches torch's reshape-(2, D*H)
    # masking): first D*H lanes get keep[...,0], last D*H lanes keep[...,1].
    mask_full = jnp.repeat(keep, D * H, axis=-1)                   # (B, S, 2*D*H) f32

    def gather_pair(x):                                            # (B,H,S,D) -> (B*H*S, 2D) bf16
        l = jnp.take_along_axis(x, pairs[:, None, :, 0:1], axis=2)
        r = jnp.take_along_axis(x, pairs[:, None, :, 1:2], axis=2)
        fused = jnp.concatenate([l, r], axis=-1).astype(jnp.bfloat16)
        return fused.reshape(B * H * S, 2 * D)                     # leading-dim collapse only

    q2, k2, v2 = gather_pair(query), gather_pair(key), gather_pair(value)
    # TODO(synk): at large S/B the seq gathers should move inside the pallas_call
    # (scalar-prefetched pair indices + memory_space=pl.ANY row DMAs) to avoid
    # materializing gathered copies in HBM; negligible at S=8.

    steps = _num_grid_steps(B)
    bs = B // steps                                                # batch elems per step
    rows = bs * H * S                                              # fused sublane rows per step

    # Block-diagonal additive bias over the bs*H groups of S rows (constant).
    grp = np.arange(rows) // S
    bias = jnp.asarray(np.where(grp[:, None] == grp[None, :], 0.0, -1e30),
                       dtype=jnp.float32)                          # (rows, rows)

    row_spec = pl.BlockSpec((rows, 2 * D), lambda i: (i, 0))
    slab_spec = pl.BlockSpec((bs, S, 2 * D * H), lambda i: (i, 0, 0))

    # Data per step is a few KiB — far below every generation's VMEM limit, so
    # no explicit vmem_limit_bytes is needed (re-derive if S/B/H scale up,
    # especially for v7x's 64 MiB VMEM).
    slab = pl.pallas_call(
        functools.partial(_fused_pair_attn_kernel, heads_num=H, seq_len=S,
                          batch_per_step=bs),
        out_shape=jax.ShapeDtypeStruct((B, S, 2 * D * H), jnp.float32),
        grid=(steps,),
        in_specs=[row_spec, row_spec, row_spec,
                  pl.BlockSpec((rows, rows), lambda i: (0, 0)),
                  slab_spec],
        out_specs=slab_spec,
        compiler_params=pltpu.CompilerParams(
            dimension_semantics=("parallel",)),
    )(q2, k2, v2, bias, mask_full)

    # Trivial 2-way sum kept in XLA so the kernel store stays lane-dense
    # (2*D*H = 128 lanes) instead of a masked 64-lane store.
    return slab.reshape(B, S, 2, D * H).sum(axis=2)                # (B, S, D*heads_num)


# ----------------------------------------------------------------------------
# Pure-JAX reference mirroring the PyTorch forward (for verification).
# Operands are rounded to bf16 exactly where the kernel's MXU consumes bf16,
# so remaining kernel-vs-reference differences are accumulation-order /
# approx-reciprocal level (~1e-4..1e-3).
# ----------------------------------------------------------------------------
def _reference_forward(query, key, value, top_k_centers, heads_num):
    B, H, S, D = query.shape
    pairs = _get_pairs(top_k_centers)
    tmp = jnp.arange(S, dtype=pairs.dtype)[None, :, None]
    flipped_mask = pairs != tmp

    def gather_seq(x, idx):
        return jnp.take_along_axis(x, idx[:, None, :, None], axis=2)

    r = lambda x: x.astype(jnp.bfloat16).astype(jnp.float32)
    lq = r(gather_seq(query, pairs[..., 0])); rq = r(gather_seq(query, pairs[..., 1]))
    lk = r(gather_seq(key,   pairs[..., 0])); rk = r(gather_seq(key,   pairs[..., 1]))
    lv = r(gather_seq(value, pairs[..., 0])); rv = r(gather_seq(value, pairs[..., 1]))

    hp = jax.lax.Precision.HIGHEST
    a2 = (jnp.einsum("bhsd,bhtd->bhst", lq, lk, precision=hp)
          + jnp.einsum("bhsd,bhtd->bhst", rq, rk, precision=hp))
    p = r(jax.nn.softmax(a2, axis=-1))                   # kernel rounds p to bf16 pre-PV
    val = jnp.concatenate([lv, rv], axis=-1)
    o2 = jnp.einsum("bhst,bhtd->bhsd", p, val, precision=hp) * (1.0 / math.sqrt(2.0 * D))
    o2 = jnp.transpose(o2, (0, 2, 1, 3)).reshape(B, S, H * 2 * D)
    o2 = o2.reshape(B, S, 2, D * heads_num)
    o2 = jnp.where(flipped_mask[..., None], 0.0, o2)
    return o2.sum(axis=2)


if __name__ == "__main__":
    B, H, S, D = 2, 2, 8, 32  # batch, heads, seq (num objects), d_model
    root = jax.random.PRNGKey(0)
    k1, k2, k3, k4 = jax.random.split(root, 4)
    query = jax.random.normal(k1, (B, H, S, D), dtype=jnp.float32)
    key_t = jax.random.normal(k2, (B, H, S, D), dtype=jnp.float32)
    value = jax.random.normal(k3, (B, H, S, D), dtype=jnp.float32)
    # top_k_centers in (cx, cy, h, w) format
    top_k_centers = jax.random.uniform(k4, (B, S, 4), dtype=jnp.float32,
                                       minval=0.1, maxval=0.9)

    fwd = jax.jit(pair_self_attention_forward, static_argnums=(4,))
    out = jax.block_until_ready(fwd(query, key_t, value, top_k_centers, H))

    ref = _reference_forward(query, key_t, value, top_k_centers, H)
    np.testing.assert_allclose(np.asarray(out), np.asarray(ref),
                               rtol=5e-3, atol=2e-3)
    print("KERNEL_OK")
</pallas_src>

<mosaic_0001>
module attributes {stable_mosaic.version = 11 : i64} {
  func.func @_fused_pair_attn_kernel(%arg0: i32, %arg1: memref<32x64xbf16, #tpu.memory_space<vmem>>, %arg2: memref<32x64xbf16, #tpu.memory_space<vmem>>, %arg3: memref<32x64xbf16, #tpu.memory_space<vmem>>, %arg4: memref<32x32xf32, #tpu.memory_space<vmem>>, %arg5: memref<2x8x128xf32, #tpu.memory_space<vmem>>, %arg6: memref<2x8x128xf32, #tpu.memory_space<vmem>>) attributes {dimension_semantics = [#tpu.dimension_semantics<parallel>], iteration_bounds = array<i64: 1>, scalar_prefetch = 0 : i64, scratch_operands = 0 : i64, tpu.core_type = #tpu.core_type<tc>, window_params = [{transform_indices = @transform_0, window_bounds = array<i64: 32, 64>}, {transform_indices = @transform_1, window_bounds = array<i64: 32, 64>}, {transform_indices = @transform_2, window_bounds = array<i64: 32, 64>}, {pipeline_mode = #tpu.pipeline_mode<synchronous>, transform_indices = @transform_3, window_bounds = array<i64: 32, 32>}, {transform_indices = @transform_4, window_bounds = array<i64: 2, 8, 128>}, {transform_indices = @transform_5, window_bounds = array<i64: 2, 8, 128>}]} {
    %c0 = arith.constant 0 : index
    %c0_0 = arith.constant 0 : index
    %0 = vector.load %arg1[%c0, %c0_0] : memref<32x64xbf16, #tpu.memory_space<vmem>>, vector<32x64xbf16>
    %c0_1 = arith.constant 0 : index
    %c0_2 = arith.constant 0 : index
    %1 = vector.load %arg2[%c0_1, %c0_2] : memref<32x64xbf16, #tpu.memory_space<vmem>>, vector<32x64xbf16>
    %c0_3 = arith.constant 0 : index
    %c0_4 = arith.constant 0 : index
    %2 = vector.load %arg3[%c0_3, %c0_4] : memref<32x64xbf16, #tpu.memory_space<vmem>>, vector<32x64xbf16>
    %cst = arith.constant dense<0.000000e+00> : vector<32x32xf32>
    %3 = tpu.matmul %0, %1, %cst {dimension_numbers = #tpu.dot_dimension_numbers<[1], [1], [0], [0], [0, 0, 1, 0], [], []>} : vector<32x64xbf16>, vector<32x64xbf16>, vector<32x32xf32> -> vector<32x32xf32>
    %c0_5 = arith.constant 0 : index
    %c0_6 = arith.constant 0 : index
    %4 = vector.load %arg4[%c0_5, %c0_6] : memref<32x32xf32, #tpu.memory_space<vmem>>, vector<32x32xf32>
    %5 = arith.addf %3, %4 : vector<32x32xf32>
    %cst_7 = arith.constant dense<0xFF800000> : vector<32xf32>
    %6 = vector.multi_reduction <maximumf>, %5, %cst_7 [1] : vector<32x32xf32> to vector<32xf32>
    %7 = vector.shape_cast %6 : vector<32xf32> to vector<32x1xf32>
    %8 = vector.broadcast %7 : vector<32x1xf32> to vector<32x32xf32>
    %9 = arith.subf %5, %8 : vector<32x32xf32>
    %10 = math.exp %9 : vector<32x32xf32>
    %cst_8 = arith.constant dense<0.000000e+00> : vector<32xf32>
    %11 = vector.multi_reduction <add>, %10, %cst_8 [1] : vector<32x32xf32> to vector<32xf32>
    %12 = vector.shape_cast %11 : vector<32xf32> to vector<32x1xf32>
    %13 = tpu.reciprocal %12 {approx = true} : vector<32x1xf32> -> vector<32x1xf32>
    %14 = vector.broadcast %13 : vector<32x1xf32> to vector<32x32xf32>
    %15 = arith.mulf %10, %14 : vector<32x32xf32>
    %16 = arith.truncf %15 : vector<32x32xf32> to vector<32x32xbf16>
    %cst_9 = arith.constant dense<0.000000e+00> : vector<32x64xf32>
    %17 = tpu.matmul %16, %2, %cst_9 {dimension_numbers = #tpu.dot_dimension_numbers<[1], [0], [0], [1], [0, 0, 1, 1], [], []>} : vector<32x32xbf16>, vector<32x64xbf16>, vector<32x64xf32> -> vector<32x64xf32>
    %18 = vector.extract_strided_slice %17 {offsets = [0, 0], sizes = [8, 64], strides = [1, 1]} : vector<32x64xf32> to vector<8x64xf32>
    %19 = vector.extract_strided_slice %17 {offsets = [8, 0], sizes = [8, 64], strides = [1, 1]} : vector<32x64xf32> to vector<8x64xf32>
    %20 = tpu.concatenate %18, %19 in 1 : vector<8x64xf32>, vector<8x64xf32> -> vector<8x128xf32>
    %c0_10 = arith.constant 0 : index
    %c0_11 = arith.constant 0 : index
    %c0_12 = arith.constant 0 : index
    %21 = vector.load %arg5[%c0_10, %c0_11, %c0_12] : memref<2x8x128xf32, #tpu.memory_space<vmem>>, vector<1x8x128xf32>
    %22 = vector.shape_cast %21 : vector<1x8x128xf32> to vector<8x128xf32>
    %23 = arith.mulf %20, %22 : vector<8x128xf32>
    %c0_13 = arith.constant 0 : index
    %c0_14 = arith.constant 0 : index
    %c0_15 = arith.constant 0 : index
    %24 = vector.load %arg6[%c0_13, %c0_14, %c0_15] : memref<2x8x128xf32, #tpu.memory_space<vmem>>, vector<1x8x128xf32>
    %25 = vector.shape_cast %24 : vector<1x8x128xf32> to vector<8x128xf32>
    %26 = vector.shape_cast %23 : vector<8x128xf32> to vector<1x8x128xf32>
    tpu.vector_store %arg6[%c0_13, %c0_14, %c0_15], %26 {strides = array<i32>} : memref<2x8x128xf32, #tpu.memory_space<vmem>>, vector<1x8x128xf32>,
    %27 = vector.extract_strided_slice %17 {offsets = [16, 0], sizes = [8, 64], strides = [1, 1]} : vector<32x64xf32> to vector<8x64xf32>
    %28 = vector.extract_strided_slice %17 {offsets = [24, 0], sizes = [8, 64], strides = [1, 1]} : vector<32x64xf32> to vector<8x64xf32>
    %29 = tpu.concatenate %27, %28 in 1 : vector<8x64xf32>, vector<8x64xf32> -> vector<8x128xf32>
    %c1 = arith.constant 1 : index
    %c0_16 = arith.constant 0 : index
    %c0_17 = arith.constant 0 : index
    %30 = vector.load %arg5[%c1, %c0_16, %c0_17] : memref<2x8x128xf32, #tpu.memory_space<vmem>>, vector<1x8x128xf32>
    %31 = vector.shape_cast %30 : vector<1x8x128xf32> to vector<8x128xf32>
    %32 = arith.mulf %29, %31 : vector<8x128xf32>
    %c1_18 = arith.constant 1 : index
    %c0_19 = arith.constant 0 : index
    %c0_20 = arith.constant 0 : index
    %33 = vector.load %arg6[%c1_18, %c0_19, %c0_20] : memref<2x8x128xf32, #tpu.memory_space<vmem>>, vector<1x8x128xf32>
    %34 = vector.shape_cast %33 : vector<1x8x128xf32> to vector<8x128xf32>
    %35 = vector.shape_cast %32 : vector<8x128xf32> to vector<1x8x128xf32>
    tpu.vector_store %arg6[%c1_18, %c0_19, %c0_20], %35 {strides = array<i32>} : memref<2x8x128xf32, #tpu.memory_space<vmem>>, vector<1x8x128xf32>,
    return
  }
  func.func @transform_0(%arg0: i32) -> (i32, i32) {
    %c0_i32 = arith.constant 0 : i32
    %c0_i32_0 = arith.constant 0 : i32
    return %arg0, %c0_i32 : i32, i32
  }
  func.func @transform_1(%arg0: i32) -> (i32, i32) {
    %c0_i32 = arith.constant 0 : i32
    %c0_i32_0 = arith.constant 0 : i32
    return %arg0, %c0_i32 : i32, i32
  }
  func.func @transform_2(%arg0: i32) -> (i32, i32) {
    %c0_i32 = arith.constant 0 : i32
    %c0_i32_0 = arith.constant 0 : i32
    return %arg0, %c0_i32 : i32, i32
  }
  func.func @transform_3(%arg0: i32) -> (i32, i32) {
    %c0_i32 = arith.constant 0 : i32
    %c0_i32_0 = arith.constant 0 : i32
    %c0_i32_1 = arith.constant 0 : i32
    return %c0_i32, %c0_i32_0 : i32, i32
  }
  func.func @transform_4(%arg0: i32) -> (i32, i32, i32) {
    %c0_i32 = arith.constant 0 : i32
    %c0_i32_0 = arith.constant 0 : i32
    %c0_i32_1 = arith.constant 0 : i32
    return %arg0, %c0_i32, %c0_i32_0 : i32, i32, i32
  }
  func.func @transform_5(%arg0: i32) -> (i32, i32, i32) {
    %c0_i32 = arith.constant 0 : i32
    %c0_i32_0 = arith.constant 0 : i32
    %c0_i32_1 = arith.constant 0 : i32
    return %arg0, %c0_i32, %c0_i32_0 : i32, i32, i32
  }
}

</mosaic_0001>

<bundles_post_ra>
// kernel: pair_self_attention_forward.1
= control target key start
LH: loop header
LB: loop body
LE: loop exit
PB: predicated region body
PF: predicated region fallthrough
CT: control target
= control target key end

     0   :  { %vm57_vm0 = vcmask 523264   ;;  %vm89_vm1 = vcmask 261120   ;;  %s341_s1 = inlined_call_operand.vmem [shape: bf16[32,64], index: 1, kind: input, shape index: {}]   ;;  %s342_s0 = inlined_call_operand.vmem [shape: bf16[32,64], index: 0, kind: input, shape index: {}]   ;;  %s343_s3 = inlined_call_operand.vmem [shape: f32[32,32], index: 3, kind: input, shape index: {}]   ;;  %s344_s2 = inlined_call_operand.vmem [shape: bf16[32,64], index: 2, kind: input, shape index: {}]   ;;  %s345_s4 = inlined_call_operand.vmem [shape: f32[2,8,128], index: 4, kind: input, shape index: {}]   ;;  %s346_s5 = inlined_call_operand.vmem [shape: f32[2,8,128], index: 5, kind: output, shape index: {}]  }
   0x1   :  { %v228_v0 = vld [vmem:[%s341_s1 + $0x8] sm:$0xff]  ;;  %v227_v2 = vld [vmem:[%s341_s1] sm:$0xff]  ;;  %v35_v10 = vld [vmem:[%s343_s3 + $0x10] sm:$0xff] }
   0x2   :  { %v68_v1 = vsel %vm57_vm0, %v228_v0, 0  ;;  %v65_v3 = vsel %vm57_vm0, %v227_v2, 0  ;;  %v225_v4 = vld [vmem:[%s342_s0] sm:$0xff]  ;;  %v226_v5 = vld [vmem:[%s342_s0 + $0x8] sm:$0xff]  ;;  %v36_v18 = vld [vmem:[%s343_s3 + $0x18] sm:$0xff] }
   0x3   :  { %76 = vmatpush.bf16.xpose.msra.mxu0 %v68_v1  ;;  %231 = vmatpush.bf16.xpose.msra.mxu2 %v68_v1  ;;  %v33_v6 = vld [vmem:[%s343_s3] sm:$0xff]  ;;  %v34_v12 = vld [vmem:[%s343_s3 + $0x8] sm:$0xff] }
   0x4   :  { %v230_v42 = vld [vmem:[%s344_s2 + $0x8] sm:$0xff]  ;;  %v229_v43 = vld [vmem:[%s344_s2] sm:$0xff]  ;;  %s252_s2 = smov 64  }
   0x5   :  { %160 = vmatpush.bf16.msra.mxu1 %v230_v42  ;;  %233 = vmatpush.bf16.msra.mxu3 %v230_v42  ;;  %v178_v62 = vld [vmem:[%s345_s4] sm:$0xff]  ;;  %v223_v2 = vld [vmem:[%s345_s4 + $0x8] sm:$0xff] }
   0x9   :  { %161 = vmatpush.bf16.msra.mxu1 %v229_v43  ;;  %234 = vmatpush.bf16.msra.mxu3 %v229_v43 }
   0xb   :  { %77 = vmatpush.bf16.xpose.msra.mxu0 %v65_v3  ;;  %232 = vmatpush.bf16.xpose.msra.mxu2 %v65_v3 }
  0x12   :  { %211 = vmatmul.msk.bf16.vlgmr.msra.gmra.mxu0 %vm57_vm0, %v225_v4  ;;  %212 = vmatmul.msk.bf16.vlgmr.msra.gmra.mxu2 %vm57_vm0, %v226_v5 }
  0x8f   :  { %v79_v7 = vpop.f32.mrf.mxu0 }
  0x90   :  { %v80_v8 = vadd.f32 %v79_v7, %v33_v6 }
  0x92   :  { %v90_v9 = vsel %vm89_vm1, %v80_v8, -inf }
  0x93   :  { %91 = vmax.xlane.f32.xlu1 %v90_v9 }
  0x95   :  { %v84_v11 = vpop.f32.mrf.mxu2 }
  0x96   :  { %v85_v13 = vadd.f32 %v84_v11, %v35_v10 }
  0x97   :  { %v81_v14 = vpop.f32.mrf.mxu0 }
  0x98   :  { %v82_v15 = vadd.f32 %v81_v14, %v34_v12  ;;  %v96_v16 = vsel %vm89_vm1, %v85_v13, -inf }
  0x99   :  { %97 = vmax.xlane.f32.xlu0 %v96_v16 }
  0x9a   :  { %v93_v17 = vsel %vm89_vm1, %v82_v15, -inf }
  0x9b   :  { %94 = vmax.xlane.f32.xlu1 %v93_v17 }
  0x9d   :  { %v86_v19 = vpop.f32.mrf.mxu2 }
  0x9e   :  { %v87_v20 = vadd.f32 %v86_v19, %v36_v18 }
  0xa0   :  { %v99_v21 = vsel %vm89_vm1, %v87_v20, -inf }
  0xa1   :  { %100 = vmax.xlane.f32.xlu0 %v99_v21 }
 0x106   :  { %v92_v22 = vpop.xlane.xlu1 %91 }
 0x107   :  { %v102_v23 = vsub.f32 %v80_v8, %v92_v22 }
 0x109   :  { %v106_v24 = vmul.f32 1.442695, %v102_v23 }
 0x10b   :  { %236 = vpow2.f32 %v106_v24 }
 0x10c   :  { %v98_v25 = vpop.xlane.xlu0 %97 }
 0x10d   :  { %v104_v26 = vsub.f32 %v85_v13, %v98_v25 }
 0x10e   :  { %v95_v27 = vpop.xlane.xlu1 %94 }
 0x10f   :  { %v110_v28 = vmul.f32 1.442695, %v104_v26  ;;  %v103_v29 = vsub.f32 %v82_v15, %v95_v27 }
 0x111   :  { %v237_v30 = vpop.eup %236  ;;  %238 = vpow2.f32 %v110_v28  ;;  %v108_v31 = vmul.f32 1.442695, %v103_v29 }
 0x112   :  { %v114_v32 = vsel %vm89_vm1, %v237_v30, 0.0 }
 0x113   :  { %240 = vpow2.f32 %v108_v31  ;;  %115 = vadd.xlane.f32.xlu0 %v114_v32 }
 0x114   :  { %v101_v33 = vpop.xlane.xlu0 %100 }
 0x115   :  { %v105_v34 = vsub.f32 %v87_v20, %v101_v33 }
 0x117   :  { %v239_v35 = vpop.eup %238  ;;  %v112_v36 = vmul.f32 1.442695, %v105_v34 }
 0x118   :  { %v120_v37 = vsel %vm89_vm1, %v239_v35, 0.0 }
 0x119   :  { %v241_v38 = vpop.eup %240  ;;  %242 = vpow2.f32 %v112_v36  ;;  %121 = vadd.xlane.f32.xlu2 %v120_v37 }
 0x11a   :  { %v117_v39 = vsel %vm89_vm1, %v241_v38, 0.0 }
 0x11b   :  { %118 = vadd.xlane.f32.xlu1 %v117_v39 }
 0x11f   :  { %v243_v40 = vpop.eup %242 }
 0x120   :  { %v123_v41 = vsel %vm89_vm1, %v243_v40, 0.0 }
 0x121   :  { %124 = vadd.xlane.f32.xlu2 %v123_v41 }
 0x186   :  { %v116_v44 = vpop.xlane.xlu0 %115 }
 0x187   :  { %244 = vrcp.f32 %v116_v44 }
 0x18c   :  { %v122_v45 = vpop.xlane.xlu2 %121 }
 0x18d   :  { %v245_v47 = vpop.eup %244 }
 0x18e   :  { %v119_v46 = vpop.xlane.xlu1 %118  ;;  %v130_v50 = vmul.f32 %v245_v47, %v237_v30 }
 0x18f   :  { %246 = vrcp.f32 %v119_v46 }
 0x190   :  { %248 = vrcp.f32 %v122_v45 }
 0x194   :  { %v125_v48 = vpop.xlane.xlu2 %124 }
 0x195   :  { %v247_v49 = vpop.eup %246  ;;  %250 = vrcp.f32 %v125_v48 }
 0x196   :  { %v131_v51 = vmul.f32 %v247_v49, %v241_v38  ;;  %v249_v53 = vpop.eup %248 }
 0x197   :  { %v132_v55 = vmul.f32 %v249_v53, %v239_v35 }
 0x198   :  { %v134_v52 = vpack.c.bf16 %v131_v51, %v130_v50 }
 0x19a   :  { %221 = vmatmul.msk.bf16.vlgmr.msra.gmra.mxu1 %vm89_vm1, %v134_v52 }
 0x19b   :  { %v251_v54 = vpop.eup %250 }
 0x19c   :  { %v133_v56 = vmul.f32 %v251_v54, %v243_v40 }
 0x19e   :  { %v135_v57 = vpack.c.bf16 %v133_v56, %v132_v55 }
 0x1a0   :  { %222 = vmatmul.msk.bf16.vlgmr.msra.gmra.mxu3 %vm89_vm1, %v135_v57 }
 0x217   :  { %v163_v58 = vpop.f32.mrf.mxu1 }
 0x21f   :  { %v165_v59 = vpop.f32.mrf.mxu1 }
 0x220   :  { %174 = vrot.lane.b32.xlu2 %v165_v59, %s252_s2 }
 0x223   :  { %v168_v60 = vpop.f32.mrf.mxu3 }
 0x22b   :  { %v170_v61 = vpop.f32.mrf.mxu3 }
 0x22c   :  { %182 = vrot.lane.b32.xlu0 %v170_v61, %s252_s2 }
 0x27a   :  { %v175_v63 = vpop.permute.xlu2 %174 }
 0x27b   :  { %v177_v0 = vsel %vm57_vm0, %v163_v58, %v175_v63 }
 0x27c   :  { %v179_v1 = vmul.f32 %v178_v62, %v177_v0 }
 0x27e   :  { %180 = vst [vmem:[%s346_s5] sm:$0xff] %v179_v1 }
 0x29e   :  { %v183_v3 = vpop.permute.xlu0 %182 }
 0x29f   :  { %v185_v4 = vsel %vm57_vm0, %v168_v60, %v183_v3 }
 0x2a0   :  { %v188_v5 = vmul.f32 %v223_v2, %v185_v4 }
 0x2a2   :  { %224 = vst [vmem:[%s346_s5 + $0x8] sm:$0xff] %v188_v5 }

</bundles_post_ra>
